<compile_context>
chip_gen: v6e
topology: v6e:2x2x1
jax: 0.10.0
libtpu: 0.0.40
codegen_flags: <defaults>
</compile_context>

<pallas_src>
import math

import jax
import jax.numpy as jnp
from jax.experimental import pallas as pl
from jax.experimental.pallas import tpu as pltpu


_C0 = math.sqrt(2.0 / math.pi)       # sqrt(2/pi)
_C1 = _C0 * 0.044715                 # fused constant: sqrt(2/pi) * 0.044715

_LANES = 128
_TARGET_BLOCK_BYTES = 4 * 1024 * 1024   # ~4 MiB of HBM traffic per grid step (storage dtype)
_MAX_BLOCK_ELEMS = 1 << 20              # cap: keeps each f32 intermediate <= 4 MiB in VMEM
# Explicit scoped-VMEM budget: > v5e's 16 MiB default (so the bigger blocks compile there),
# comfortably below v7x's 64 MiB physical VMEM.  Steady-state footprint with 1M-element
# blocks: <= 16 MiB of double-buffered in/out + a few 4 MiB f32 intermediates.
_VMEM_LIMIT_BYTES = 40 * 1024 * 1024


def _gelu_kernel(x_ref, o_ref):
    # Compute in f32 regardless of storage dtype; cast back on store.
    x = x_ref[...].astype(jnp.float32)
    x2 = x * x
    # inner == sqrt(2/pi) * (x + 0.044715 * x^3), with the constant pre-fused.
    inner = x * (_C0 + _C1 * x2)
    y = 0.5 * x * (1.0 + jnp.tanh(inner))   # tanh -> EUP slot (otherwise idle)
    o_ref[...] = y.astype(o_ref.dtype)


def _sublane_multiple(dtype) -> int:
    """Minimum sublane tiling multiple for the packed dtype."""
    itemsize = jnp.dtype(dtype).itemsize
    if itemsize >= 4:
        return 8
    if itemsize == 2:
        return 16
    return 32


def _run_gelu_2d(x2d: jax.Array) -> jax.Array:
    rows, cols = x2d.shape
    dtype = x2d.dtype
    itemsize = jnp.dtype(dtype).itemsize
    sub = _sublane_multiple(dtype)
    cols_padded = -(-cols // _LANES) * _LANES   # lane-padded width -> true VMEM footprint

    # Block sizing by storage *bytes* (so bf16 keeps the same HBM bytes/step as f32),
    # capped in elements so f32 intermediates don't blow past the VMEM budget.
    block_elems = min(_TARGET_BLOCK_BYTES // itemsize, _MAX_BLOCK_ELEMS)
    target_rows = max(1, block_elems // cols_padded)

    if target_rows >= rows:
        if rows >= 2 * sub:
            # Whole tensor would fit one block: still split into two blocks so both
            # TensorCores of a v7x megacore get work on the "parallel" axis.
            half = -(-rows // 2)
            tile_rows = min(rows, -(-half // sub) * sub)
        else:
            tile_rows = rows              # full-extent block: always legal
    else:
        # Round down to the dtype's packed-sublane multiple; Pallas masks the ragged
        # last block via pl.cdiv.
        tile_rows = max(sub, (target_rows // sub) * sub)

    grid = (pl.cdiv(rows, tile_rows),)

    n = rows * cols
    cost = pl.CostEstimate(
        flops=7 * n,                      # ~7 VPU ops per element
        transcendentals=n,                # one tanh per element
        bytes_accessed=2 * n * itemsize,  # one read + one write of the tensor
    )

    return pl.pallas_call(
        _gelu_kernel,
        out_shape=jax.ShapeDtypeStruct((rows, cols), dtype),
        grid_spec=pltpu.PrefetchScalarGridSpec(
            num_scalar_prefetch=0,
            grid=grid,
            in_specs=[pl.BlockSpec((tile_rows, cols), lambda i: (i, 0))],
            out_specs=pl.BlockSpec((tile_rows, cols), lambda i: (i, 0)),
        ),
        compiler_params=pltpu.CompilerParams(
            # Row-block axis is independent -> shard across TensorCores (v7x megacore).
            dimension_semantics=("parallel",),
            vmem_limit_bytes=_VMEM_LIMIT_BYTES,
        ),
        cost_estimate=cost,
    )(x2d)


# Lane widths to try for the copy-free fast path, widest (most lane-dense) first.
_COL_CANDIDATES = (4096, 2048, 1024, 512, 256, 128)


def _custom_gelu(x: jax.Array) -> jax.Array:
    """Elementwise tanh-GELU matching the PyTorch CustomGELU module."""
    orig_shape = x.shape
    n = x.size
    if n == 0:
        return x

    # Fast path: flattened size divides cleanly into a wide lane-dense slab,
    # so there is zero padding / extra HBM traffic outside the kernel.
    for cols in _COL_CANDIDATES:
        if n % cols == 0:
            out2d = _run_gelu_2d(x.reshape(n // cols, cols))
            return out2d.reshape(orig_shape)

    # Copy-free ragged path: view as (prod(leading), last_dim).  The lane dim stays
    # full-extent in the BlockSpec (legal regardless of 128-divisibility), so the tensor
    # is processed in ONE pass with no pad / slice / concat traffic.  Only taken when a
    # minimal (sub, lane-padded cols) block fits the per-block element budget.
    if x.ndim >= 2:
        cols = orig_shape[-1]
        sub = _sublane_multiple(x.dtype)
        cols_padded = -(-cols // _LANES) * _LANES
        if cols_padded * sub <= _MAX_BLOCK_ELEMS:
            rows = n // cols
            out2d = _run_gelu_2d(x.reshape(rows, cols))
            return out2d.reshape(orig_shape)

    # Last resort (ragged 1-D input or pathologically wide last dim): one pad pass + slice.
    cols = _LANES
    rows = pl.cdiv(n, cols)
    pad = rows * cols - n
    flat = jnp.pad(x.reshape(-1), (0, pad))
    out2d = _run_gelu_2d(flat.reshape(rows, cols))
    return out2d.reshape(-1)[:n].reshape(orig_shape)


# jit so reshapes are metadata-only and dispatch overhead disappears for small tensors.
custom_gelu = jax.jit(_custom_gelu)


def _ref_gelu(x):
    xf = x.astype(jnp.float32)
    y = 0.5 * xf * (1.0 + jnp.tanh(_C0 * (xf + 0.044715 * jnp.power(xf, 3))))
    return y.astype(x.dtype)


if __name__ == "__main__":
    key = jax.random.PRNGKey(0)

    # Small GPT-activation-like shape: (batch=2, seq=8, hidden=32) -> fast path, 1 block.
    x = jax.random.normal(key, (2, 8, 32), dtype=jnp.float32)
    out = custom_gelu(x)
    jax.block_until_ready(out)
    ref = _ref_gelu(x)
    assert out.shape == x.shape and out.dtype == x.dtype
    assert jnp.allclose(out, ref, atol=1e-5, rtol=1e-5)

    # Ragged shape -> exercises the copy-free (prod(leading), last_dim) ragged path.
    x2 = jax.random.normal(jax.random.PRNGKey(1), (3, 5, 7), dtype=jnp.float32)
    out2 = custom_gelu(x2)
    jax.block_until_ready(out2)
    assert out2.shape == x2.shape
    assert jnp.allclose(out2, _ref_gelu(x2), atol=1e-5, rtol=1e-5)

    # bf16 input: compute in f32 inside the kernel, cast back on store.
    x3 = jax.random.normal(jax.random.PRNGKey(2), (2, 16, 128), dtype=jnp.bfloat16)
    out3 = custom_gelu(x3)
    jax.block_until_ready(out3)
    assert out3.dtype == jnp.bfloat16 and out3.shape == x3.shape
    assert jnp.allclose(out3.astype(jnp.float32),
                        _ref_gelu(x3).astype(jnp.float32), atol=2e-2, rtol=2e-2)

    # MLP-width shape -> exercises the >=2-block split (both v7x TensorCores get work).
    x4 = jax.random.normal(jax.random.PRNGKey(3), (2, 8, 4096), dtype=jnp.float32)
    out4 = custom_gelu(x4)
    jax.block_until_ready(out4)
    assert out4.shape == x4.shape
    assert jnp.allclose(out4, _ref_gelu(x4), atol=1e-5, rtol=1e-5)

    print("KERNEL_OK")
</pallas_src>

<mosaic_0001>
module attributes {stable_mosaic.version = 11 : i64} {
  func.func @_gelu_kernel(%arg0: i32, %arg1: memref<1x512xf32, #tpu.memory_space<vmem>>, %arg2: memref<1x512xf32, #tpu.memory_space<vmem>>) attributes {dimension_semantics = [#tpu.dimension_semantics<parallel>], iteration_bounds = array<i64: 1>, scalar_prefetch = 0 : i64, scratch_operands = 0 : i64, tpu.core_type = #tpu.core_type<tc>, window_params = [{transform_indices = @transform_0, window_bounds = array<i64: 1, 512>}, {transform_indices = @transform_1, window_bounds = array<i64: 1, 512>}]} {
    %c0 = arith.constant 0 : index
    %c0_0 = arith.constant 0 : index
    %0 = vector.load %arg1[%c0, %c0_0] : memref<1x512xf32, #tpu.memory_space<vmem>>, vector<1x512xf32>
    %1 = arith.mulf %0, %0 : vector<1x512xf32>
    %cst = arith.constant 0.0356774069 : f32
    %2 = vector.broadcast %cst : f32 to vector<1x512xf32>
    %3 = arith.mulf %2, %1 : vector<1x512xf32>
    %cst_1 = arith.constant 0.797884583 : f32
    %4 = vector.broadcast %cst_1 : f32 to vector<1x512xf32>
    %5 = arith.addf %4, %3 : vector<1x512xf32>
    %6 = arith.mulf %0, %5 : vector<1x512xf32>
    %cst_2 = arith.constant 5.000000e-01 : f32
    %7 = vector.broadcast %cst_2 : f32 to vector<1x512xf32>
    %8 = arith.mulf %7, %0 : vector<1x512xf32>
    %9 = math.tanh %6 : vector<1x512xf32>
    %cst_3 = arith.constant 1.000000e+00 : f32
    %10 = vector.broadcast %cst_3 : f32 to vector<1x512xf32>
    %11 = arith.addf %10, %9 : vector<1x512xf32>
    %12 = arith.mulf %8, %11 : vector<1x512xf32>
    %c0_4 = arith.constant 0 : index
    %c0_5 = arith.constant 0 : index
    %13 = vector.load %arg2[%c0_4, %c0_5] : memref<1x512xf32, #tpu.memory_space<vmem>>, vector<1x512xf32>
    tpu.vector_store %arg2[%c0_4, %c0_5], %12 {strides = array<i32>} : memref<1x512xf32, #tpu.memory_space<vmem>>, vector<1x512xf32>,
    return
  }
  func.func @transform_0(%arg0: i32) -> (i32, i32) {
    %c0_i32 = arith.constant 0 : i32
    %c0_i32_0 = arith.constant 0 : i32
    return %arg0, %c0_i32 : i32, i32
  }
  func.func @transform_1(%arg0: i32) -> (i32, i32) {
    %c0_i32 = arith.constant 0 : i32
    %c0_i32_0 = arith.constant 0 : i32
    return %arg0, %c0_i32 : i32, i32
  }
}

</mosaic_0001>

<bundles_post_ra>
// kernel: _custom_gelu.1
= control target key start
LH: loop header
LB: loop body
LE: loop exit
PB: predicated region body
PF: predicated region fallthrough
CT: control target
= control target key end

     0   :  { %v17_v5 = vlaneseq  ;;  %s44_s0 = inlined_call_operand.vmem [shape: f32[1,512], index: 0, kind: input, shape index: {}]   ;;  %s45_s1 = inlined_call_operand.vmem [shape: f32[1,512], index: 1, kind: output, shape index: {}]  }
   0x1   :  { %v8_v0 = vld [vmem:[%s44_s0] sm:$0xf] }
   0x2   :  { %v9_v1 = vmul.f32 %v8_v0, %v8_v0  ;;  %v13_v6 = vmul.f32 0.5, %v8_v0  ;;  %vm19_vm0 = vcmp.lt.s32.totalorder %v17_v5, 512 }
   0x4   :  { %v10_v2 = vmul.f32 0.035677407, %v9_v1 }
   0x6   :  { %v11_v3 = vadd.f32 0.7978846, %v10_v2 }
   0x8   :  { %v12_v4 = vmul.f32 %v11_v3, %v8_v0 }
   0xa   :  { %26 = vtanh.f32 %v12_v4 }
  0x17   :  { %v27_v7 = vpop.eup %26 }
  0x18   :  { %v15_v8 = vadd.f32 1.0, %v27_v7 }
  0x1a   :  { %v16_v9 = vmul.f32 %v15_v8, %v13_v6 }
  0x1c   :  { %21 = vst.msk [vmem:[%s45_s1] sm:$0xf] %vm19_vm0, %v16_v9 }

</bundles_post_ra>
